<compile_context>
chip_gen: v6e
topology: v6e:2x2x1
jax: 0.10.0
libtpu: 0.0.40
codegen_flags: <defaults>
</compile_context>

<pallas_src>
import functools

import jax
import jax.numpy as jnp
from jax.experimental import pallas as pl
from jax.experimental.pallas import tpu as pltpu


def _joint_grad_kernel(fus_ref, ir_ref, vi_ref, out_ref, *, h, w, rows):
    """One grid step: a (bb, h, w) block of each (unpadded) input, native dtype."""
    si = pl.program_id(1)

    @pl.when(si == 0)
    def _():
        out_ref[...] = jnp.zeros_like(out_ref)

    def lap16(ref):
        # 16 * kornia.filters.laplacian(x, 3) with border_type='reflect'
        # (PyTorch 'reflect' == reflect-without-edge-repeat, same as jnp.pad 'reflect').
        # The /16 normalization is applied once to the final scalar in the wrapper.
        p = ref[...]
        if p.dtype != jnp.float32:
            p = p.astype(jnp.float32)
        # Horizontal 3-tap box sum with in-kernel reflect border (no padded copies):
        #   left[j]  = p[j-1] for j>0,  p[1]   at j=0
        #   right[j] = p[j+1] for j<w-1, p[w-2] at j=w-1
        left = jnp.concatenate([p[:, :, 1:2], p[:, :, : w - 1]], axis=2)
        right = jnp.concatenate([p[:, :, 1:], p[:, :, w - 2: w - 1]], axis=2)
        q = left + p + right                               # (bb, h, w)
        # Vertical 3-tap box sum with reflect border.
        up = jnp.concatenate([q[:, 1:2, :], q[:, : h - 1, :]], axis=1)
        down = jnp.concatenate([q[:, 1:, :], q[:, h - 2: h - 1, :]], axis=1)
        box = up + q + down                                # 3x3 box sum of p
        return box - 9.0 * p                               # 16 * laplacian

    lap_ir = lap16(ir_ref)
    lap_vi = lap16(vi_ref)
    lap_fus = lap16(fus_ref)

    # torch.where(|lap(ir)| - |lap(vi)| >= 0, lap(ir), lap(vi))  (scale-equivariant)
    jgrad = jnp.where(jnp.abs(lap_ir) - jnp.abs(lap_vi) >= 0.0, lap_ir, lap_vi)
    d = jnp.abs(jgrad - lap_fus)                           # (bb, h, w), 16x-scaled

    # Fold the batch dim and the h/rows sublane-tile groups with plain VPU adds
    # (no cross-lane ops, no reshape across the (8,128) tiling), then accumulate
    # into the small resident (1, rows, w) output block.
    part = jnp.sum(d, axis=0, keepdims=True)               # (1, h, w)
    acc = part[:, 0:rows, :]
    for t in range(1, h // rows):                          # static unroll, aligned slices
        acc = acc + part[:, t * rows:(t + 1) * rows, :]
    out_ref[...] += acc


def joint_grad_loss(im_fus, im_ir, im_vi):
    """Pallas TPU implementation of JointGrad.forward(im_fus, im_ir, im_vi)."""
    assert im_fus.shape == im_ir.shape == im_vi.shape
    n, c, h, w = im_fus.shape
    assert h >= 2 and w >= 2, "reflect border needs spatial dims >= 2"
    b = n * c

    # Free reshape only -- no padded HBM copies of the inputs.
    fus = im_fus.reshape(b, h, w)
    ir = im_ir.reshape(b, h, w)
    vi = im_vi.reshape(b, h, w)

    # Chip-aware VMEM budget (128 MiB on v5e/v6e, 64 MiB on v7x).
    try:
        vmem_cap = int(pltpu.get_tpu_info().vmem_capacity_bytes)
    except Exception:
        vmem_cap = 64 << 20
    vmem_limit = int(min((vmem_cap * 3) // 4, 96 << 20))

    # Per-image cost inside one grid step:
    #   3 inputs x 2 pipeline buffers in native dtype + ~9 live f32 temporaries
    #   (casts, q/up/down, 3 laplacians, jgrad/|diff|).
    in_itemsize = jnp.dtype(im_fus.dtype).itemsize
    per_img_bytes = h * w * (6 * in_itemsize + 9 * 4)
    budget = vmem_limit - (2 << 20)
    max_bb = max(1, budget // per_img_bytes)
    # TODO(synk): if a single image exceeds the VMEM budget (very large frames on v7x),
    # add a row-band tiling fallback with a 1-row halo instead of whole-image blocks.
    # TODO(synk): for W < 128, packing several rows/images along the lane axis would
    # remove masked-lane waste on loads/stores; not done here (needs a relayout).

    # Pick the largest image-count per block that divides b; prefer a split with an
    # even number of blocks so the leading "parallel" axis can use both v7x TensorCores.
    bb_even, bb_any = None, 1
    for d in range(1, b + 1):
        if b % d != 0 or d > max_bb:
            continue
        bb_any = d
        if (b // d) % 2 == 0:
            bb_even = d
    if bb_even is not None:
        bb, g = bb_even, 2
    else:
        bb, g = bb_any, 1          # odd block count: whole reduction on one core
    steps = (b // bb) // g

    rows = 8 if h % 8 == 0 else h   # shrunken accumulator height

    in_spec = pl.BlockSpec((bb, h, w), lambda gi, si: (gi * steps + si, 0, 0))

    partials = pl.pallas_call(
        functools.partial(_joint_grad_kernel, h=h, w=w, rows=rows),
        out_shape=jax.ShapeDtypeStruct((g, rows, w), jnp.float32),
        grid_spec=pltpu.PrefetchScalarGridSpec(
            num_scalar_prefetch=0,
            grid=(g, steps),
            in_specs=[in_spec, in_spec, in_spec],
            out_specs=pl.BlockSpec((1, rows, w), lambda gi, si: (gi, 0, 0)),
        ),
        compiler_params=pltpu.CompilerParams(
            dimension_semantics=("parallel", "arbitrary"),
            vmem_limit_bytes=vmem_limit,
        ),
    )(fus, ir, vi)

    # Tiny final reduction + deferred 1/16 Laplacian normalization + L1 mean.
    return jnp.sum(partials) / jnp.float32(16.0 * n * c * h * w)


if __name__ == "__main__":
    key = jax.random.PRNGKey(0)
    kf, ki, kv = jax.random.split(key, 3)
    shape = (2, 4, 16, 16)  # NCHW, as in the PyTorch module
    im_fus = jax.random.normal(kf, shape, dtype=jnp.float32)
    im_ir = jax.random.normal(ki, shape, dtype=jnp.float32)
    im_vi = jax.random.normal(kv, shape, dtype=jnp.float32)

    loss = jax.block_until_ready(joint_grad_loss(im_fus, im_ir, im_vi))

    # Pure-JAX reference with the same semantics as the PyTorch/kornia module.
    def lap_ref(x):
        hh, ww = x.shape[-2:]
        p = jnp.pad(x.astype(jnp.float32), ((0, 0), (0, 0), (1, 1), (1, 1)), mode="reflect")
        box = sum(p[..., di:di + hh, dj:dj + ww] for di in range(3) for dj in range(3))
        return (box - 9.0 * p[..., 1:1 + hh, 1:1 + ww]) / 16.0

    lf, li, lv = lap_ref(im_fus), lap_ref(im_ir), lap_ref(im_vi)
    jg = jnp.where(jnp.abs(li) - jnp.abs(lv) >= 0.0, li, lv)
    ref = jnp.mean(jnp.abs(jg - lf))

    assert jnp.allclose(loss, ref, rtol=1e-5, atol=1e-6), (loss, ref)
    print("KERNEL_OK")
</pallas_src>

<mosaic_0001>
module attributes {stable_mosaic.version = 11 : i64} {
  func.func @_joint_grad_kernel(%arg0: i32, %arg1: i32, %arg2: memref<4x16x16xf32, #tpu.memory_space<vmem>>, %arg3: memref<4x16x16xf32, #tpu.memory_space<vmem>>, %arg4: memref<4x16x16xf32, #tpu.memory_space<vmem>>, %arg5: memref<1x8x16xf32, #tpu.memory_space<vmem>>) attributes {dimension_semantics = [#tpu.dimension_semantics<parallel>, #tpu.dimension_semantics<arbitrary>], iteration_bounds = array<i64: 2, 1>, scalar_prefetch = 0 : i64, scratch_operands = 0 : i64, tpu.core_type = #tpu.core_type<tc>, window_params = [{transform_indices = @transform_0, window_bounds = array<i64: 4, 16, 16>}, {transform_indices = @transform_1, window_bounds = array<i64: 4, 16, 16>}, {transform_indices = @transform_2, window_bounds = array<i64: 4, 16, 16>}, {transform_indices = @transform_3, window_bounds = array<i64: 1, 8, 16>}]} {
    %c0_i32 = arith.constant 0 : i32
    %0 = arith.cmpi eq, %arg1, %c0_i32 : i32
    %1 = arith.extui %0 : i1 to i32
    %c0_i32_0 = arith.constant 0 : i32
    %2 = arith.cmpi ne, %1, %c0_i32_0 : i32
    scf.if %2 {
      %cst_19 = arith.constant 0.000000e+00 : f32
      %79 = vector.broadcast %cst_19 : f32 to vector<1x8x16xf32>
      %c0_20 = arith.constant 0 : index
      %c0_21 = arith.constant 0 : index
      %c0_22 = arith.constant 0 : index
      %80 = vector.load %arg5[%c0_20, %c0_21, %c0_22] : memref<1x8x16xf32, #tpu.memory_space<vmem>>, vector<1x8x16xf32>
      tpu.vector_store %arg5[%c0_20, %c0_21, %c0_22], %79 {strides = array<i32>} : memref<1x8x16xf32, #tpu.memory_space<vmem>>, vector<1x8x16xf32>,
    } else {
    }
    %c0 = arith.constant 0 : index
    %c0_1 = arith.constant 0 : index
    %c0_2 = arith.constant 0 : index
    %3 = vector.load %arg3[%c0, %c0_1, %c0_2] : memref<4x16x16xf32, #tpu.memory_space<vmem>>, vector<4x16x16xf32>
    %4 = vector.extract_strided_slice %3 {offsets = [0, 0, 1], sizes = [4, 16, 1], strides = [1, 1, 1]} : vector<4x16x16xf32> to vector<4x16x1xf32>
    %5 = vector.extract_strided_slice %3 {offsets = [0, 0, 0], sizes = [4, 16, 15], strides = [1, 1, 1]} : vector<4x16x16xf32> to vector<4x16x15xf32>
    %6 = tpu.concatenate %4, %5 in 2 : vector<4x16x1xf32>, vector<4x16x15xf32> -> vector<4x16x16xf32>
    %7 = vector.extract_strided_slice %3 {offsets = [0, 0, 1], sizes = [4, 16, 15], strides = [1, 1, 1]} : vector<4x16x16xf32> to vector<4x16x15xf32>
    %8 = vector.extract_strided_slice %3 {offsets = [0, 0, 14], sizes = [4, 16, 1], strides = [1, 1, 1]} : vector<4x16x16xf32> to vector<4x16x1xf32>
    %9 = tpu.concatenate %7, %8 in 2 : vector<4x16x15xf32>, vector<4x16x1xf32> -> vector<4x16x16xf32>
    %10 = arith.addf %6, %3 : vector<4x16x16xf32>
    %11 = arith.addf %10, %9 : vector<4x16x16xf32>
    %12 = vector.extract_strided_slice %11 {offsets = [0, 1, 0], sizes = [4, 1, 16], strides = [1, 1, 1]} : vector<4x16x16xf32> to vector<4x1x16xf32>
    %13 = vector.extract_strided_slice %11 {offsets = [0, 0, 0], sizes = [4, 15, 16], strides = [1, 1, 1]} : vector<4x16x16xf32> to vector<4x15x16xf32>
    %14 = tpu.concatenate %12, %13 in 1 : vector<4x1x16xf32>, vector<4x15x16xf32> -> vector<4x16x16xf32>
    %15 = vector.extract_strided_slice %11 {offsets = [0, 1, 0], sizes = [4, 15, 16], strides = [1, 1, 1]} : vector<4x16x16xf32> to vector<4x15x16xf32>
    %16 = vector.extract_strided_slice %11 {offsets = [0, 14, 0], sizes = [4, 1, 16], strides = [1, 1, 1]} : vector<4x16x16xf32> to vector<4x1x16xf32>
    %17 = tpu.concatenate %15, %16 in 1 : vector<4x15x16xf32>, vector<4x1x16xf32> -> vector<4x16x16xf32>
    %18 = arith.addf %14, %11 : vector<4x16x16xf32>
    %19 = arith.addf %18, %17 : vector<4x16x16xf32>
    %cst = arith.constant 9.000000e+00 : f32
    %20 = vector.broadcast %cst : f32 to vector<4x16x16xf32>
    %21 = arith.mulf %20, %3 : vector<4x16x16xf32>
    %22 = arith.subf %19, %21 : vector<4x16x16xf32>
    %c0_3 = arith.constant 0 : index
    %c0_4 = arith.constant 0 : index
    %c0_5 = arith.constant 0 : index
    %23 = vector.load %arg4[%c0_3, %c0_4, %c0_5] : memref<4x16x16xf32, #tpu.memory_space<vmem>>, vector<4x16x16xf32>
    %24 = vector.extract_strided_slice %23 {offsets = [0, 0, 1], sizes = [4, 16, 1], strides = [1, 1, 1]} : vector<4x16x16xf32> to vector<4x16x1xf32>
    %25 = vector.extract_strided_slice %23 {offsets = [0, 0, 0], sizes = [4, 16, 15], strides = [1, 1, 1]} : vector<4x16x16xf32> to vector<4x16x15xf32>
    %26 = tpu.concatenate %24, %25 in 2 : vector<4x16x1xf32>, vector<4x16x15xf32> -> vector<4x16x16xf32>
    %27 = vector.extract_strided_slice %23 {offsets = [0, 0, 1], sizes = [4, 16, 15], strides = [1, 1, 1]} : vector<4x16x16xf32> to vector<4x16x15xf32>
    %28 = vector.extract_strided_slice %23 {offsets = [0, 0, 14], sizes = [4, 16, 1], strides = [1, 1, 1]} : vector<4x16x16xf32> to vector<4x16x1xf32>
    %29 = tpu.concatenate %27, %28 in 2 : vector<4x16x15xf32>, vector<4x16x1xf32> -> vector<4x16x16xf32>
    %30 = arith.addf %26, %23 : vector<4x16x16xf32>
    %31 = arith.addf %30, %29 : vector<4x16x16xf32>
    %32 = vector.extract_strided_slice %31 {offsets = [0, 1, 0], sizes = [4, 1, 16], strides = [1, 1, 1]} : vector<4x16x16xf32> to vector<4x1x16xf32>
    %33 = vector.extract_strided_slice %31 {offsets = [0, 0, 0], sizes = [4, 15, 16], strides = [1, 1, 1]} : vector<4x16x16xf32> to vector<4x15x16xf32>
    %34 = tpu.concatenate %32, %33 in 1 : vector<4x1x16xf32>, vector<4x15x16xf32> -> vector<4x16x16xf32>
    %35 = vector.extract_strided_slice %31 {offsets = [0, 1, 0], sizes = [4, 15, 16], strides = [1, 1, 1]} : vector<4x16x16xf32> to vector<4x15x16xf32>
    %36 = vector.extract_strided_slice %31 {offsets = [0, 14, 0], sizes = [4, 1, 16], strides = [1, 1, 1]} : vector<4x16x16xf32> to vector<4x1x16xf32>
    %37 = tpu.concatenate %35, %36 in 1 : vector<4x15x16xf32>, vector<4x1x16xf32> -> vector<4x16x16xf32>
    %38 = arith.addf %34, %31 : vector<4x16x16xf32>
    %39 = arith.addf %38, %37 : vector<4x16x16xf32>
    %cst_6 = arith.constant 9.000000e+00 : f32
    %40 = vector.broadcast %cst_6 : f32 to vector<4x16x16xf32>
    %41 = arith.mulf %40, %23 : vector<4x16x16xf32>
    %42 = arith.subf %39, %41 : vector<4x16x16xf32>
    %c0_7 = arith.constant 0 : index
    %c0_8 = arith.constant 0 : index
    %c0_9 = arith.constant 0 : index
    %43 = vector.load %arg2[%c0_7, %c0_8, %c0_9] : memref<4x16x16xf32, #tpu.memory_space<vmem>>, vector<4x16x16xf32>
    %44 = vector.extract_strided_slice %43 {offsets = [0, 0, 1], sizes = [4, 16, 1], strides = [1, 1, 1]} : vector<4x16x16xf32> to vector<4x16x1xf32>
    %45 = vector.extract_strided_slice %43 {offsets = [0, 0, 0], sizes = [4, 16, 15], strides = [1, 1, 1]} : vector<4x16x16xf32> to vector<4x16x15xf32>
    %46 = tpu.concatenate %44, %45 in 2 : vector<4x16x1xf32>, vector<4x16x15xf32> -> vector<4x16x16xf32>
    %47 = vector.extract_strided_slice %43 {offsets = [0, 0, 1], sizes = [4, 16, 15], strides = [1, 1, 1]} : vector<4x16x16xf32> to vector<4x16x15xf32>
    %48 = vector.extract_strided_slice %43 {offsets = [0, 0, 14], sizes = [4, 16, 1], strides = [1, 1, 1]} : vector<4x16x16xf32> to vector<4x16x1xf32>
    %49 = tpu.concatenate %47, %48 in 2 : vector<4x16x15xf32>, vector<4x16x1xf32> -> vector<4x16x16xf32>
    %50 = arith.addf %46, %43 : vector<4x16x16xf32>
    %51 = arith.addf %50, %49 : vector<4x16x16xf32>
    %52 = vector.extract_strided_slice %51 {offsets = [0, 1, 0], sizes = [4, 1, 16], strides = [1, 1, 1]} : vector<4x16x16xf32> to vector<4x1x16xf32>
    %53 = vector.extract_strided_slice %51 {offsets = [0, 0, 0], sizes = [4, 15, 16], strides = [1, 1, 1]} : vector<4x16x16xf32> to vector<4x15x16xf32>
    %54 = tpu.concatenate %52, %53 in 1 : vector<4x1x16xf32>, vector<4x15x16xf32> -> vector<4x16x16xf32>
    %55 = vector.extract_strided_slice %51 {offsets = [0, 1, 0], sizes = [4, 15, 16], strides = [1, 1, 1]} : vector<4x16x16xf32> to vector<4x15x16xf32>
    %56 = vector.extract_strided_slice %51 {offsets = [0, 14, 0], sizes = [4, 1, 16], strides = [1, 1, 1]} : vector<4x16x16xf32> to vector<4x1x16xf32>
    %57 = tpu.concatenate %55, %56 in 1 : vector<4x15x16xf32>, vector<4x1x16xf32> -> vector<4x16x16xf32>
    %58 = arith.addf %54, %51 : vector<4x16x16xf32>
    %59 = arith.addf %58, %57 : vector<4x16x16xf32>
    %cst_10 = arith.constant 9.000000e+00 : f32
    %60 = vector.broadcast %cst_10 : f32 to vector<4x16x16xf32>
    %61 = arith.mulf %60, %43 : vector<4x16x16xf32>
    %62 = arith.subf %59, %61 : vector<4x16x16xf32>
    %63 = math.absf %22 : vector<4x16x16xf32>
    %64 = math.absf %42 : vector<4x16x16xf32>
    %65 = arith.subf %63, %64 : vector<4x16x16xf32>
    %cst_11 = arith.constant 0.000000e+00 : f32
    %66 = vector.broadcast %cst_11 : f32 to vector<4x16x16xf32>
    %67 = arith.cmpf oge, %65, %66 : vector<4x16x16xf32>
    %68 = arith.select %67, %22, %42 : vector<4x16x16xi1>, vector<4x16x16xf32>
    %69 = arith.subf %68, %62 : vector<4x16x16xf32>
    %70 = math.absf %69 : vector<4x16x16xf32>
    %cst_12 = arith.constant dense<0.000000e+00> : vector<16x16xf32>
    %71 = vector.multi_reduction <add>, %70, %cst_12 [0] : vector<4x16x16xf32> to vector<16x16xf32>
    %72 = vector.shape_cast %71 : vector<16x16xf32> to vector<1x16x16xf32>
    %73 = vector.extract_strided_slice %72 {offsets = [0, 0, 0], sizes = [1, 8, 16], strides = [1, 1, 1]} : vector<1x16x16xf32> to vector<1x8x16xf32>
    %74 = vector.extract_strided_slice %72 {offsets = [0, 8, 0], sizes = [1, 8, 16], strides = [1, 1, 1]} : vector<1x16x16xf32> to vector<1x8x16xf32>
    %75 = arith.addf %73, %74 : vector<1x8x16xf32>
    %c0_13 = arith.constant 0 : index
    %c0_14 = arith.constant 0 : index
    %c0_15 = arith.constant 0 : index
    %76 = vector.load %arg5[%c0_13, %c0_14, %c0_15] : memref<1x8x16xf32, #tpu.memory_space<vmem>>, vector<1x8x16xf32>
    %77 = arith.addf %76, %75 : vector<1x8x16xf32>
    %c0_16 = arith.constant 0 : index
    %c0_17 = arith.constant 0 : index
    %c0_18 = arith.constant 0 : index
    %78 = vector.load %arg5[%c0_16, %c0_17, %c0_18] : memref<1x8x16xf32, #tpu.memory_space<vmem>>, vector<1x8x16xf32>
    tpu.vector_store %arg5[%c0_16, %c0_17, %c0_18], %77 {strides = array<i32>} : memref<1x8x16xf32, #tpu.memory_space<vmem>>, vector<1x8x16xf32>,
    return
  }
  func.func @transform_0(%arg0: i32, %arg1: i32) -> (i32, i32, i32) {
    %c1_i32 = arith.constant 1 : i32
    %0 = arith.muli %arg0, %c1_i32 : i32
    %1 = arith.addi %0, %arg1 : i32
    %c0_i32 = arith.constant 0 : i32
    %c0_i32_0 = arith.constant 0 : i32
    %c0_i32_1 = arith.constant 0 : i32
    return %1, %c0_i32, %c0_i32_0 : i32, i32, i32
  }
  func.func @transform_1(%arg0: i32, %arg1: i32) -> (i32, i32, i32) {
    %c1_i32 = arith.constant 1 : i32
    %0 = arith.muli %arg0, %c1_i32 : i32
    %1 = arith.addi %0, %arg1 : i32
    %c0_i32 = arith.constant 0 : i32
    %c0_i32_0 = arith.constant 0 : i32
    %c0_i32_1 = arith.constant 0 : i32
    return %1, %c0_i32, %c0_i32_0 : i32, i32, i32
  }
  func.func @transform_2(%arg0: i32, %arg1: i32) -> (i32, i32, i32) {
    %c1_i32 = arith.constant 1 : i32
    %0 = arith.muli %arg0, %c1_i32 : i32
    %1 = arith.addi %0, %arg1 : i32
    %c0_i32 = arith.constant 0 : i32
    %c0_i32_0 = arith.constant 0 : i32
    %c0_i32_1 = arith.constant 0 : i32
    return %1, %c0_i32, %c0_i32_0 : i32, i32, i32
  }
  func.func @transform_3(%arg0: i32, %arg1: i32) -> (i32, i32, i32) {
    %c0_i32 = arith.constant 0 : i32
    %c0_i32_0 = arith.constant 0 : i32
    %c0_i32_1 = arith.constant 0 : i32
    return %arg0, %c0_i32, %c0_i32_0 : i32, i32, i32
  }
}

</mosaic_0001>

<bundles_post_ra>
// kernel: tpu_custom_call.1
= control target key start
LH: loop header
LB: loop body
LE: loop exit
PB: predicated region body
PF: predicated region fallthrough
CT: control target
= control target key end

     0   :  { %s2048_s0 = inlined_call_operand.hbm [shape: f32[8,16,16], index: 0, kind: input, shape index: {}]   ;;  %s2049_s1 = inlined_call_operand.hbm [shape: f32[8,16,16], index: 1, kind: input, shape index: {}]   ;;  %s2050_s2 = inlined_call_operand.hbm [shape: f32[8,16,16], index: 2, kind: input, shape index: {}]   ;;  %s2051_s3 = inlined_call_operand.hbm [shape: f32[2,8,16], index: 3, kind: output, shape index: {}]  }
   0x1   :  { %2057 = sst [smem:[#allocation15_spill]] %s2049_s1 }
   0x2   :  { %8 = vsyncpa [#allocation3], 0 }
   0x3   :  { %10 = vsyncpa [#allocation3 + $0x1], 0 }
   0x4   :  { %11 = vsyncpa [#allocation6], 0 }
   0x5   :  { %13 = vsyncpa [#allocation6 + $0x1], 0 }
   0x6   :  { %14 = vsyncpa [#allocation4], 0 }
   0x7   :  { %16 = vsyncpa [#allocation4 + $0x1], 0  ;;  %s1402_s12 = smov 0   ;;  %s1404_s13 = smov 0  }
   0x8   :  { %s1406_s14 = smov 0   ;;  %s1408_s15 = smov 0  }
   0x9   :  { %s1410_s16 = smov 0   ;;  %s1412_s17 = smov 0  }
   0xa LB: > { %2058 = sst [smem:[#allocation12_spill]] %s1367_s16  ;;  %s1433_s18 = sadd.s32 4294967295, %s1371_s17   ;;  %s1371_s17 = sphi %s1412_s17, %s22_s17   ;;  %s1367_s16 = sphi %s1410_s16, %s2073_s16   ;;  %s1363_s15 = sphi %s1408_s15, %s2072_s15   ;;  %s1359_s14 = sphi %s1406_s14, %s2076_s14   ;;  %s1355_s13 = sphi %s1404_s13, %s2075_s13   ;;  %s1351_s12 = sphi %s1402_s12, %s2074_s12  }
   0xb   : > { %s1096_s19 = sadd.s32 4294967294, %s1371_s17   ;;  %s34_s20 = sadd.s32 1, %s1367_s16 }
   0xc   : > { %s43_s21 = sadd.s32 1, %s1359_s14  ;;  %p36_p0 = scmp.ge.s32.totalorder %s34_s20, 2 }
   0xd   : > { %p50_p1 = scmp.ne.s32.totalorder %s1359_s14, %s1355_s13  ;;  %p51_p2 = scmp.eq.s32.totalorder %s1371_s17, 0 }
   0xe   : > { %p56_p3 = scmp.ne.s32.totalorder %s1355_s13, %s1351_s12  ;;  %s2078_s20 = smov (%p36_p0, %s34_s20), 0 }
   0xf   : > { %2059 = sst [smem:[#allocation13_spill]] %s2078_s20  ;;  %p1445_p4 = por %p51_p2, %p50_p1 }
  0x10   : > { %p57_p5 = scmp.eq.s32.totalorder %s1433_s18, 0  ;;  %s40_s23 = ssub.s32 %s1367_s16, %s2078_s20 }
  0x11   : > { %p136_p6 = scmp.eq.s32.totalorder %s1433_s18, 1  ;;  %p41_p7 = scmp.eq.s32.totalorder %s40_s23, 0 }
  0x12   : > { %p1453_p8 = por %p57_p5, %p56_p3  ;;  %p142_p10 = scmp.eq.s32.totalorder %s1096_s19, 1 }
  0x13   : > { %p1457_p9 = por %p136_p6, %p50_p1  ;;  %p1148_p13 = scmp.lt.s32.totalorder %s1371_s17, 2 }
  0x14   : > { %s1462_s26 = scalar_select %p41_p7, %s1359_s14, %s43_s21  }
  0x15   : > { %p1464_p11 = por %p142_p10, %p56_p3  ;;  %s2052_s28 = sand.u32 1, %s1359_s14  }
  0x16   : > { %2063 = sst [smem:[#allocation14_spill]] %s1462_s26  ;;  %s1473_s29 = sshll.u32 %s2052_s28, 6 }
  0x17   : > { %s1476_s30 = sshll.u32 %s1367_s16, 10  ;;  %p1480_p0 = pnand %p1148_p13, %p1445_p4 }
  0x18   : > { %s185_s5 = sand.u32 1, %s1371_s17   ;;  %s2066_s1 = sld [smem:[#allocation15_spill]] }
  0x19   : > { %s189_s9 = scalar_lea.vmem [#allocation5], %s1473_s29  ;;  %p1111_p1 = scmp.ge.s32.totalorder %s1371_s17, 1 }
  0x1a   : > { %s198_s10 = sshll.u32 %s189_s9, 4  ;;  %p229_p2 = scmp.lt.s32.totalorder %s1371_s17, 3  ;;  %s199_s10 = int_to_ptr.vmem [resolvable:$true] %s198_s10 }
  0x1b   : > { %s1492_s11 = scalar_lea.sflag [#allocation6], %s185_s5  ;;  %p1205_p3 = pneg %p1480_p0 }
  0x1c   : > { %s1216_s19 = scalar_lea.vmem %s199_s10, 1024  ;;  %s1373_s21 = smov [#allocation5]  }
  0x1d   : > { %p1217_p4 = scmp.ne.s32.totalorder %s199_s10, %s1216_s19  ;;  %s1221_s22 = sshll.u32 %s1373_s21, 4  ;;  %s1222_s22 = int_to_ptr.vmem [resolvable:$false] %s1221_s22 }
  0x1e   : > { %s197_s8 = scalar_lea.hbm %s2066_s1, %s1476_s30  ;;  %s1223_s23 = scalar_lea.vmem %s1222_s22, 2048 }
  0x1f   : > { %p1219_p5 = pnand %p1217_p4, %p1205_p3  ;;  %p1224_p7 = scmp.lt.s32.totalorder %s199_s10, %s1222_s22 }
  0x20   : > { %p1225_p10 = scmp.lt.s32.totalorder %s1223_s23, %s1216_s19 }
  0x21   : > { %p1220_p6 = pneg %p1219_p5 }
  0x22   : > { %p1226_p13 = por %p1225_p10, %p1224_p7 }
  0x24   : > { %p1227_p12 = pnand %p1226_p13, %p1220_p6 }
  0x26   : > { %1230 = shalt.err (!%p1227_p12)
}
  0x27   : > { %s2055_s6 = smov 128   ;;  %s1375_s5 = smov 8  }
  0x28   : > { %1140 = dma.hbm_to_vmem [thread:$0]  (!%p1480_p0), %s197_s8, 1024, %s199_s10, %s1492_s11, %s2055_s6, %s2055_s6, %s1375_s5  }
  0x29   : > { %p1509_p4 = pnand %p1111_p1, %p229_p2  ;;  %s174_s21 = scalar_lea.hbm %s2048_s0, %s1476_s30 }
  0x2a   : > { %s166_s22 = scalar_lea.vmem [#allocation2], %s1473_s29  ;;  %s220_s20 = scalar_lea.hbm %s2050_s2, %s1476_s30 }
  0x2b   : > { %s175_s23 = sshll.u32 %s166_s22, 4  ;;  %s2068_s16 = sand.u32 1, %s1359_s14   ;;  %s176_s23 = int_to_ptr.vmem [resolvable:$true] %s175_s23 }
  0x2c   : > { %s163_s26 = scalar_lea.sflag [#allocation3], %s2068_s16  ;;  %s1244_s8 = scalar_lea.vmem %s176_s23, 1024 }
  0x2d   : > { %p1245_p12 = scmp.ne.s32.totalorder %s176_s23, %s1244_s8  ;;  %s1376_s10 = smov [#allocation2]  }
  0x2e   : > { %s1249_s6 = sshll.u32 %s1376_s10, 4  ;;  %s1250_s6 = int_to_ptr.vmem [resolvable:$false] %s1249_s6 }
  0x2f   : > { %p1247_p1 = pnand %p1245_p12, %p1205_p3  ;;  %s1251_s9 = scalar_lea.vmem %s1250_s6, 2048 }
  0x30   : > { %p1252_p5 = scmp.lt.s32.totalorder %s176_s23, %s1250_s6  ;;  %p1253_p6 = scmp.lt.s32.totalorder %s1251_s9, %s1244_s8 }
  0x31   : > { %p1248_p2 = pneg %p1247_p1 }
  0x32   : > { %p1254_p7 = por %p1253_p6, %p1252_p5 }
  0x34   : > { %p1255_p10 = pnand %p1254_p7, %p1248_p2 }
  0x36   : > { %1258 = shalt.err (!%p1255_p10)
}
  0x37   : > { %s2069_s1 = smov 128   ;;  %s212_s16 = scalar_lea.vmem [#allocation7], %s1473_s29 }
  0x38   : > { %1137 = dma.hbm_to_vmem [thread:$0]  (!%p1480_p0), %s174_s21, 1024, %s176_s23, %s163_s26, %s2069_s1, %s2069_s1, %s1375_s5  }
  0x39   : > { %s221_s28 = sshll.u32 %s212_s16, 4  ;;  %s1377_s6 = smov [#allocation7]   ;;  %s222_s28 = int_to_ptr.vmem [resolvable:$true] %s221_s28 }
  0x3a   : > { %s1272_s19 = scalar_lea.vmem %s222_s28, 1024  ;;  %s1277_s22 = sshll.u32 %s1377_s6, 4  ;;  %s1278_s22 = int_to_ptr.vmem [resolvable:$false] %s1277_s22 }
  0x3b   : > { %p1273_p13 = scmp.ne.s32.totalorder %s222_s28, %s1272_s19  ;;  %s1279_s8 = scalar_lea.vmem %s1278_s22, 2048 }
  0x3c   : > { %p1280_p2 = scmp.lt.s32.totalorder %s222_s28, %s1278_s22  ;;  %p1281_p5 = scmp.lt.s32.totalorder %s1279_s8, %s1272_s19 }
  0x3d   : > { %p1275_p12 = pnand %p1273_p13, %p1205_p3 }
  0x3e   : > { %p1282_p6 = por %p1281_p5, %p1280_p2 }
  0x3f   : > { %p1276_p1 = pneg %p1275_p12 }
  0x41   : > { %p1283_p7 = pnand %p1282_p6, %p1276_p1 }
  0x43   : > { %1286 = shalt.err (!%p1283_p7)
}
  0x44   : > { %1143 = dma.hbm_to_vmem [thread:$0]  (!%p1480_p0), %s220_s20, 1024, %s222_s28, %s1492_s11, %s2069_s1, %s2069_s1, %s1375_s5  }
  0x45   : > { %233 = sbr.rel (%p1509_p4) target bundleno = 327 (0x147), region = 32  ;;  %s1550_s21 = sand.u32 (!%p1509_p4), 1, %s1355_s13  }
  0x46   : > { %s1112_s4 = sshll.u32 (!%p1509_p4), %s1550_s21, 6  ;;  %s236_s23 = scalar_lea.sflag (!%p1509_p4), [#allocation3], %s1550_s21 }
  0x47   : > { %s1554_s10 = scalar_lea.vmem (!%p1509_p4), [#allocation2], %s1112_s4 }
  0x4a   : > { %1338 = dma.done.wait (%p1453_p8), %s236_s23, 1024  }
  0x4b   : > { %1340 = vsyncadd (%p1453_p8), %s236_s23, 4294966272  ;;  %s244_s20 = sand.u32 1, %s1433_s18   ;;  %s1561_s11 = scalar_lea.vmem [#allocation5], %s1112_s4 }
  0x4c   : > { %s245_s30 = scalar_lea.sflag [#allocation6], %s244_s20 }
  0x4d   : > { %1342 = dma.done.wait (%p1453_p8), %s245_s30, 2048  }
  0x4e   : > { %1344 = vsyncadd (%p1453_p8), %s245_s30, 4294965248  ;;  %v1568_v0 = vld [vmem:[%s1561_s11 + $0x10] sm:$0xff]  ;;  %v1571_v1 = vld [vmem:[%s1561_s11] sm:$0xff]  ;;  %s1378_s5 = smov 127   ;;  %s1379_s18 = smov 1   ;;  %vm300_vm0 = vcmask 130048  }
  0x4f   : > { %322 = vrot.lane.b32.xlu1 %v1568_v0, %s1378_s5  ;;  %318 = vrot.lane.b32.xlu0 %v1571_v1, %s1378_s5  ;;  %v1578_v2 = vld [vmem:[%s1561_s11 + $0x18] sm:$0xff]  ;;  %v1581_v3 = vld [vmem:[%s1561_s11 + $0x8] sm:$0xff]  ;;  %s1595_s24 = scalar_lea.vmem [#allocation7], %s1112_s4  ;;  %s1115_s7 = sshll.u32 %s1550_s21, 3  ;;  %v1380_v24 = vmov 0.0   ;;  %vm366_vm1 = vcmask 7168  }
  0x50   : > { %v1598_v4 = vld [vmem:[%s1595_s24 + $0x8] sm:$0xff]  ;;  %v1601_v5 = vld [vmem:[%s1595_s24] sm:$0xff]  ;;  %v1608_v6 = vld [vmem:[%s1595_s24 + $0x18] sm:$0xff]  ;;  %s1738_s9 = scalar_lea.vmem [#allocation8], %s1115_s7  ;;  %vm375_vm2 = vcmask 121856   ;;  %vm441_vm3 = vcmask 1046528  }
  0x51   : > { %v1611_v7 = vld [vmem:[%s1595_s24 + $0x10] sm:$0xff]  ;;  %v1626_v8 = vld [vmem:[%s1561_s11 + $0x28] sm:$0xff]  ;;  %v1629_v9 = vld [vmem:[%s1561_s11 + $0x20] sm:$0xff]  ;;  %301 = vst.msk [vmem:[%s1738_s9] sm:$0xff] %vm300_vm0, %v1380_v24  ;;  %vm416_vm4 = vcmask 1040384   ;;  %s1117_s1 = sshll.u32 %s1363_s15, 7 }
  0x52   : > { %v1640_v10 = vld [vmem:[%s1595_s24 + $0x28] sm:$0xff]  ;;  %v1643_v11 = vld [vmem:[%s1595_s24 + $0x20] sm:$0xff]  ;;  %v1654_v12 = vld [vmem:[%s1561_s11 + $0x38] sm:$0xff]  ;;  %s971_s16 = sshll.u32 %s1738_s9, 4  ;;  %s969_s6 = scalar_lea.hbm %s2051_s3, %s1117_s1  ;;  %s972_s16 = int_to_ptr.vmem [resolvable:$true] %s971_s16 }
  0x53   : > { %324 = vrot.lane.b32.xlu1 %v1578_v2, %s1378_s5  ;;  %320 = vrot.lane.b32.xlu0 %v1581_v3, %s1378_s5  ;;  %v1657_v13 = vld [vmem:[%s1561_s11 + $0x30] sm:$0xff]  ;;  %v1668_v14 = vld [vmem:[%s1595_s24 + $0x38] sm:$0xff]  ;;  %s958_s22 = scalar_lea.sflag [#allocation4], %s1550_s21  ;;  %s1287_s8 = scalar_lea.vmem %s972_s16, 128 }
  0x54   : > { %v1671_v15 = vld [vmem:[%s1595_s24 + $0x30] sm:$0xff]  ;;  %v1682_v16 = vld [vmem:[%s1554_s10 + $0x8] sm:$0xff]  ;;  %v1685_v17 = vld [vmem:[%s1554_s10] sm:$0xff]  ;;  %p1288_p8 = scmp.ne.s32.totalorder %s972_s16, %s1287_s8  ;;  %s1381_s26 = smov [#allocation8]  }
  0x55   : > { %v1692_v18 = vld [vmem:[%s1554_s10 + $0x18] sm:$0xff]  ;;  %v1695_v19 = vld [vmem:[%s1554_s10 + $0x10] sm:$0xff]  ;;  %v1710_v20 = vld [vmem:[%s1554_s10 + $0x28] sm:$0xff]  ;;  %s1291_s29 = sshll.u32 %s1381_s26, 4  ;;  %s1292_s29 = int_to_ptr.vmem [resolvable:$false] %s1291_s29 }
  0x56   : > { %v1713_v21 = vld [vmem:[%s1554_s10 + $0x20] sm:$0xff]  ;;  %v1724_v22 = vld [vmem:[%s1554_s10 + $0x38] sm:$0xff]  ;;  %v1727_v23 = vld [vmem:[%s1554_s10 + $0x30] sm:$0xff]  ;;  %p1289_p0 = pnand %p1288_p8, %p1457_p9  ;;  %s1293_s15 = scalar_lea.vmem %s1292_s29, 256 }
  0x57   : > { %344 = vrot.lane.b32.xlu1 %v1581_v3, %s1379_s18  ;;  %342 = vrot.lane.b32.xlu0 %v1571_v1, %s1379_s18  ;;  %p1294_p4 = scmp.lt.s32.totalorder %s972_s16, %s1292_s29  ;;  %p1295_p10 = scmp.lt.s32.totalorder %s1293_s15, %s1287_s8 }
  0x58   : > { %p1290_p3 = pneg %p1289_p0 }
  0x59   : > { %p1296_p13 = por %p1295_p10, %p1294_p4 }
  0x5b   : > { %348 = vrot.lane.b32.xlu1 %v1578_v2, %s1379_s18  ;;  %346 = vrot.lane.b32.xlu0 %v1568_v0, %s1379_s18  ;;  %p1297_p12 = pnand %p1296_p13, %p1290_p3 }
  0x5f   : > { %516 = vrot.lane.b32.xlu1 %v1598_v4, %s1378_s5  ;;  %514 = vrot.lane.b32.xlu0 %v1601_v5, %s1378_s5 }
  0x63   : > { %520 = vrot.lane.b32.xlu1 %v1608_v6, %s1378_s5  ;;  %518 = vrot.lane.b32.xlu0 %v1611_v7, %s1378_s5 }
  0x67   : > { %540 = vrot.lane.b32.xlu1 %v1598_v4, %s1379_s18  ;;  %538 = vrot.lane.b32.xlu0 %v1601_v5, %s1379_s18 }
  0x6b   : > { %544 = vrot.lane.b32.xlu1 %v1608_v6, %s1379_s18  ;;  %542 = vrot.lane.b32.xlu0 %v1611_v7, %s1379_s18 }
  0x6f   : > { %328 = vrot.lane.b32.xlu1 %v1626_v8, %s1378_s5  ;;  %326 = vrot.lane.b32.xlu0 %v1629_v9, %s1378_s5 }
  0x73   : > { %352 = vrot.lane.b32.xlu1 %v1626_v8, %s1379_s18  ;;  %350 = vrot.lane.b32.xlu0 %v1629_v9, %s1379_s18 }
  0x77   : > { %524 = vrot.lane.b32.xlu1 %v1640_v10, %s1378_s5  ;;  %522 = vrot.lane.b32.xlu0 %v1643_v11, %s1378_s5 }
  0x7b   : > { %548 = vrot.lane.b32.xlu1 %v1640_v10, %s1379_s18  ;;  %546 = vrot.lane.b32.xlu0 %v1643_v11, %s1379_s18 }
  0x7f   : > { %332 = vrot.lane.b32.xlu1 %v1654_v12, %s1378_s5  ;;  %330 = vrot.lane.b32.xlu0 %v1657_v13, %s1378_s5 }
  0x83   : > { %356 = vrot.lane.b32.xlu1 %v1654_v12, %s1379_s18  ;;  %354 = vrot.lane.b32.xlu0 %v1657_v13, %s1379_s18 }
  0x87   : > { %528 = vrot.lane.b32.xlu1 %v1668_v14, %s1378_s5  ;;  %526 = vrot.lane.b32.xlu0 %v1671_v15, %s1378_s5 }
  0x8b   : > { %552 = vrot.lane.b32.xlu1 %v1668_v14, %s1379_s18  ;;  %550 = vrot.lane.b32.xlu0 %v1671_v15, %s1379_s18 }
  0x8f   : > { %708 = vrot.lane.b32.xlu1 %v1682_v16, %s1378_s5  ;;  %706 = vrot.lane.b32.xlu0 %v1685_v17, %s1378_s5 }
  0x93   : > { %712 = vrot.lane.b32.xlu1 %v1692_v18, %s1378_s5  ;;  %710 = vrot.lane.b32.xlu0 %v1695_v19, %s1378_s5 }
  0x97   : > { %732 = vrot.lane.b32.xlu1 %v1682_v16, %s1379_s18  ;;  %730 = vrot.lane.b32.xlu0 %v1685_v17, %s1379_s18 }
  0x9b   : > { %736 = vrot.lane.b32.xlu1 %v1692_v18, %s1379_s18  ;;  %734 = vrot.lane.b32.xlu0 %v1695_v19, %s1379_s18 }
  0x9f   : > { %716 = vrot.lane.b32.xlu1 %v1710_v20, %s1378_s5  ;;  %714 = vrot.lane.b32.xlu0 %v1713_v21, %s1378_s5 }
  0xa3   : > { %740 = vrot.lane.b32.xlu1 %v1710_v20, %s1379_s18  ;;  %738 = vrot.lane.b32.xlu0 %v1713_v21, %s1379_s18 }
  0xa7   : > { %720 = vrot.lane.b32.xlu1 %v1724_v22, %s1378_s5  ;;  %718 = vrot.lane.b32.xlu0 %v1727_v23, %s1378_s5 }
  0xab   : > { %744 = vrot.lane.b32.xlu1 %v1724_v22, %s1379_s18  ;;  %742 = vrot.lane.b32.xlu0 %v1727_v23, %s1379_s18 }
  0xc1   : > { %v323_v25 = vpop.permute.xlu1 %322  ;;  %v319_v26 = vpop.permute.xlu0 %318 }
  0xc5   : > { %v325_v27 = vpop.permute.xlu1 %324  ;;  %v321_v28 = vpop.permute.xlu0 %320 }
  0xc9   : > { %v345_v29 = vpop.permute.xlu1 %344  ;;  %v343_v30 = vpop.permute.xlu0 %342 }
  0xca   : > { %v368_v31 = vsel %vm366_vm1, %v321_v28, %v345_v29  ;;  %v377_v32 = vsel %vm375_vm2, %v321_v28, %v345_v29  ;;  %v367_v33 = vsel %vm366_vm1, %v319_v26, %v343_v30  ;;  %v376_v34 = vsel %vm375_vm2, %v319_v26, %v343_v30 }
  0xcb   : > { %v385_v35 = vadd.f32 %v368_v31, %v1581_v3  ;;  %v384_v36 = vadd.f32 %v367_v33, %v1571_v1 }
  0xcd   : > { %v393_v37 = vadd.f32 %v385_v35, %v377_v32  ;;  %v392_v38 = vadd.f32 %v384_v36, %v376_v34  ;;  %v349_v39 = vpop.permute.xlu1 %348  ;;  %v347_v40 = vpop.permute.xlu0 %346 }
  0xce   : > { %v370_v41 = vsel %vm366_vm1, %v325_v27, %v349_v39  ;;  %v379_v42 = vsel %vm375_vm2, %v325_v27, %v349_v39  ;;  %v369_v43 = vsel %vm366_vm1, %v323_v25, %v347_v40  ;;  %v378_v44 = vsel %vm375_vm2, %v323_v25, %v347_v40 }
  0xcf   : > { %v418_v45 = vrot.slane %v393_v37, 7  ;;  %v442_v46 = vrot.slane %v393_v37, 1  ;;  %v404_v47 = vrot.slane %v392_v38, 1  ;;  %v417_v48 = vrot.slane %v392_v38, 7 }
  0xd0   : > { %v387_v49 = vadd.f32 %v370_v41, %v1578_v2  ;;  %v386_v50 = vadd.f32 %v369_v43, %v1568_v0 }
  0xd1   : > { %v419_v51 = vsel %vm416_vm4, %v417_v48, %v418_v45  ;;  %v437_v52 = vsel %vm416_vm4, %v404_v47, %v417_v48  ;;  %v443_v53 = vsel %vm441_vm3, %v404_v47, %v442_v46  ;;  %v517_v54 = vpop.permute.xlu1 %516  ;;  %v515_v55 = vpop.permute.xlu0 %514  ;;  %v462_v60 = vsel %vm441_vm3, %v442_v46, %v418_v45 }
  0xd2   : > { %v466_v56 = vadd.f32 %v437_v52, %v392_v38  ;;  %v467_v57 = vadd.f32 %v419_v51, %v393_v37  ;;  %v395_v58 = vadd.f32 %v387_v49, %v379_v42  ;;  %v394_v59 = vadd.f32 %v386_v50, %v378_v44 }
  0xd3   : > { %v484_v48 = vmul.f32 9.0, %v1568_v0  ;;  %v482_v49 = vmul.f32 9.0, %v1571_v1  ;;  %v483_v52 = vmul.f32 9.0, %v1581_v3  ;;  %v674_v0 = vmul.f32 9.0, %v1601_v5 }
  0xd4   : > { %v474_v61 = vadd.f32 %v466_v56, %v443_v53  ;;  %v475_v62 = vadd.f32 %v467_v57, %v462_v60  ;;  %v421_v63 = vrot.slane %v395_v58, 7  ;;  %v444_v24 = vrot.slane %v395_v58, 1 }
  0xd5   : > { %v405_v25 = vrot.slane %v394_v59, 1  ;;  %v420_v26 = vrot.slane %v394_v59, 7  ;;  %v521_v27 = vpop.permute.xlu1 %520  ;;  %v519_v28 = vpop.permute.xlu0 %518  ;;  %v675_v60 = vmul.f32 9.0, %v1598_v4 }
  0xd6   : > { %v463_v34 = vsel %vm441_vm3, %v444_v24, %v421_v63  ;;  %v1780_v3 = vsub.f32 %v474_v61, %v482_v49  ;;  %v485_v61 = vmul.f32 9.0, %v1578_v2 }
  0xd7   : > { %v422_v29 = vsel %vm416_vm4, %v420_v26, %v421_v63  ;;  %v438_v30 = vsel %vm416_vm4, %v405_v25, %v420_v26  ;;  %v445_v31 = vsel %vm441_vm3, %v405_v25, %v444_v24 }
  0xd8   : > { %v468_v32 = vadd.f32 %v438_v30, %v394_v59  ;;  %v469_v33 = vadd.f32 %v422_v29, %v395_v58 }
  0xd9   : > { %v541_v35 = vpop.permute.xlu1 %540  ;;  %v539_v36 = vpop.permute.xlu0 %538 }
  0xda   : > { %v476_v37 = vadd.f32 %v468_v32, %v445_v31  ;;  %v1762_v38 = vadd.f32 %v469_v33, %v463_v34  ;;  %v563_v39 = vsel %vm366_vm1, %v517_v54, %v541_v35  ;;  %v562_v41 = vsel %vm366_vm1, %v515_v55, %v539_v36 }
  0xdb   : > { %v579_v40 = vadd.f32 %v563_v39, %v1598_v4  ;;  %v571_v42 = vsel %vm375_vm2, %v517_v54, %v541_v35  ;;  %v578_v43 = vadd.f32 %v562_v41, %v1601_v5  ;;  %v570_v45 = vsel %vm375_vm2, %v515_v55, %v539_v36 }
  0xdc   : > { %v677_v36 = vmul.f32 9.0, %v1608_v6 }
  0xdd   : > { %v587_v44 = vadd.f32 %v579_v40, %v571_v42  ;;  %v545_v46 = vpop.permute.xlu1 %544  ;;  %v543_v47 = vpop.permute.xlu0 %542  ;;  %v586_v50 = vadd.f32 %v578_v43, %v570_v45  ;;  %v882_v43 = vand.u32 2147483647, %v1780_v3 }
  0xde   : > { %v565_v51 = vsel %vm366_vm1, %v521_v27, %v545_v46  ;;  %v573_v59 = vsel %vm375_vm2, %v521_v27, %v545_v46  ;;  %v564_v55 = vsel %vm366_vm1, %v519_v28, %v543_v47  ;;  %v1785_v27 = vsub.f32 %v475_v62, %v483_v52 }
  0xdf   : > { %v611_v53 = vrot.slane %v587_v44, 7  ;;  %v634_v56 = vrot.slane %v587_v44, 1  ;;  %v581_v54 = vadd.f32 %v565_v51, %v1608_v6  ;;  %v598_v57 = vrot.slane %v586_v50, 1 }
  0xe0   : > { %v610_v58 = vrot.slane %v586_v50, 7  ;;  %v580_v63 = vadd.f32 %v564_v55, %v1611_v7  ;;  %v572_v4 = vsel %vm375_vm2, %v519_v28, %v543_v47  ;;  %v676_v62 = vmul.f32 9.0, %v1611_v7 }
  0xe1   : > { %v589_v1 = vadd.f32 %v581_v54, %v573_v59  ;;  %v329_v24 = vpop.permute.xlu1 %328  ;;  %v327_v25 = vpop.permute.xlu0 %326  ;;  %v635_v30 = vsel %vm441_vm3, %v598_v57, %v634_v56  ;;  %v654_v5 = vsel %vm441_vm3, %v634_v56, %v611_v53  ;;  %v883_v28 = vand.u32 2147483647, %v1785_v27 }
  0xe2   : > { %v612_v26 = vsel %vm416_vm4, %v610_v58, %v611_v53  ;;  %v630_v29 = vsel %vm416_vm4, %v598_v57, %v610_v58  ;;  %v588_v35 = vadd.f32 %v580_v63, %v572_v4  ;;  %v492_v46 = vsub.f32 %v476_v37, %v484_v48 }
  0xe3   : > { %v658_v31 = vadd.f32 %v630_v29, %v586_v50  ;;  %v659_v32 = vadd.f32 %v612_v26, %v587_v44  ;;  %v614_v33 = vrot.slane %v589_v1, 7  ;;  %v636_v34 = vrot.slane %v589_v1, 1 }
  0xe4   : > { %v599_v44 = vrot.slane %v588_v35, 1  ;;  %v613_v45 = vrot.slane %v588_v35, 7  ;;  %v493_v58 = vsub.f32 %v1762_v38, %v485_v61  ;;  %v884_v26 = vand.u32 2147483647, %v492_v46 }
  0xe5   : > { %v666_v39 = vadd.f32 %v658_v31, %v635_v30  ;;  %v667_v40 = vadd.f32 %v659_v32, %v654_v5  ;;  %v353_v41 = vpop.permute.xlu1 %352  ;;  %v351_v42 = vpop.permute.xlu0 %350  ;;  %v655_v37 = vsel %vm441_vm3, %v636_v34, %v614_v33 }
  0xe6   : > { %v615_v50 = vsel %vm416_vm4, %v613_v45, %v614_v33  ;;  %v631_v2 = vsel %vm416_vm4, %v599_v44, %v613_v45  ;;  %v637_v6 = vsel %vm441_vm3, %v599_v44, %v636_v34  ;;  %v371_v51 = vsel %vm366_vm1, %v327_v25, %v351_v42 }
  0xe7   : > { %v682_v47 = vsub.f32 %v666_v39, %v674_v0  ;;  %v683_v49 = vsub.f32 %v667_v40, %v675_v60  ;;  %v660_v7 = vadd.f32 %v631_v2, %v588_v35  ;;  %v661_v56 = vadd.f32 %v615_v50, %v589_v1 }
  0xe8   : > { %v372_v48 = vsel %vm366_vm1, %v329_v24, %v353_v41  ;;  %v388_v63 = vadd.f32 %v371_v51, %v1629_v9  ;;  %v885_v1 = vand.u32 2147483647, %v493_v58  ;;  %v380_v38 = vsel %vm375_vm2, %v327_v25, %v351_v42 }
  0xe9   : > { %v890_v52 = vand.u32 2147483647, %v682_v47  ;;  %v891_v53 = vand.u32 2147483647, %v683_v49  ;;  %v525_v54 = vpop.permute.xlu1 %524  ;;  %v523_v57 = vpop.permute.xlu0 %522  ;;  %v668_v60 = vadd.f32 %v660_v7, %v637_v6  ;;  %v669_v0 = vadd.f32 %v661_v56, %v655_v37 }
  0xea   : > { %v389_v4 = vadd.f32 %v372_v48, %v1626_v8  ;;  %v381_v61 = vsel %vm375_vm2, %v329_v24, %v353_v41  ;;  %v396_v39 = vadd.f32 %v388_v63, %v380_v38  ;;  %v487_v63 = vmul.f32 9.0, %v1626_v8 }
  0xeb   : > { %v898_v59 = vsub.f32 %v882_v43, %v890_v52  ;;  %v899_v55 = vsub.f32 %v883_v28, %v891_v53  ;;  %v684_v29 = vsub.f32 %v668_v60, %v676_v62  ;;  %v685_v30 = vsub.f32 %v669_v0, %v677_v36 }
  0xec   : > { %v397_v25 = vadd.f32 %v389_v4, %v381_v61  ;;  %v406_v6 = vrot.slane %v396_v39, 1  ;;  %v423_v51 = vrot.slane %v396_v39, 7  ;;  %v678_v4 = vmul.f32 9.0, %v1643_v11 }
  0xed   : > { %v549_v31 = vpop.permute.xlu1 %548  ;;  %v547_v32 = vpop.permute.xlu0 %546  ;;  %vm907_vm5 = vcmp.ge.f32.partialorder %v899_v55, 0.0  ;;  %v892_v33 = vand.u32 2147483647, %v684_v29  ;;  %v893_v34 = vand.u32 2147483647, %v685_v30  ;;  %vm906_vm6 = vcmp.ge.f32.partialorder %v898_v59, 0.0 }
  0xee   : > { %v567_v5 = vsel %vm366_vm1, %v525_v54, %v549_v31  ;;  %v566_v40 = vsel %vm366_vm1, %v523_v57, %v547_v32  ;;  %v575_v43 = vsel %vm375_vm2, %v525_v54, %v549_v31  ;;  %v1812_v50 = vsel %vm907_vm5, %v1785_v27, %v683_v49 }
  0xef   : > { %v583_v35 = vadd.f32 %v567_v5, %v1640_v10  ;;  %v900_v36 = vsub.f32 %v884_v26, %v892_v33  ;;  %v901_v62 = vsub.f32 %v885_v1, %v893_v34  ;;  %v582_v28 = vadd.f32 %v566_v40, %v1643_v11 }
  0xf0   : > { %v574_v24 = vsel %vm375_vm2, %v523_v57, %v547_v32  ;;  %v1816_v2 = vsel %vm906_vm6, %v1780_v3, %v682_v47  ;;  %v424_v54 = vrot.slane %v397_v25, 7  ;;  %v439_v59 = vsel %vm416_vm4, %v406_v6, %v423_v51 }
  0xf1   : > { %v333_v44 = vpop.permute.xlu1 %332  ;;  %v331_v45 = vpop.permute.xlu0 %330  ;;  %v591_v42 = vadd.f32 %v583_v35, %v575_v43  ;;  %vm908_vm7 = vcmp.ge.f32.partialorder %v900_v36, 0.0  ;;  %vm909_vm8 = vcmp.ge.f32.partialorder %v901_v62, 0.0  ;;  %v590_v41 = vadd.f32 %v582_v28, %v574_v24 }
  0xf2   : > { %v1818_v7 = vsel %vm908_vm7, %v492_v46, %v684_v29  ;;  %v1820_v56 = vsel %vm909_vm8, %v493_v58, %v685_v30  ;;  %v446_v60 = vrot.slane %v397_v25, 1  ;;  %v425_v46 = vsel %vm416_vm4, %v423_v51, %v424_v54 }
  0xf3   : > { %v617_v37 = vrot.slane %v591_v42, 7  ;;  %v600_v27 = vrot.slane %v590_v41, 1  ;;  %v616_v49 = vrot.slane %v590_v41, 7  ;;  %v638_v26 = vrot.slane %v591_v42, 1 }
  0xf4   : > { %v486_v30 = vmul.f32 9.0, %v1629_v9  ;;  %v679_v31 = vmul.f32 9.0, %v1640_v10  ;;  %v470_v32 = vadd.f32 %v439_v59, %v396_v39  ;;  %v471_v38 = vadd.f32 %v425_v46, %v397_v25 }
  0xf5   : > { %v357_v52 = vpop.permute.xlu1 %356  ;;  %v355_v53 = vpop.permute.xlu0 %354  ;;  %v632_v3 = vsel %vm416_vm4, %v600_v27, %v616_v49  ;;  %v618_v58 = vsel %vm416_vm4, %v616_v49, %v617_v37  ;;  %v447_v61 = vsel %vm441_vm3, %v406_v6, %v446_v60  ;;  %v639_v10 = vsel %vm441_vm3, %v600_v27, %v638_v26 }
  0xf6   : > { %v374_v48 = vsel %vm366_vm1, %v333_v44, %v357_v52  ;;  %v373_v57 = vsel %vm366_vm1, %v331_v45, %v355_v53  ;;  %v662_v1 = vadd.f32 %v632_v3, %v590_v41  ;;  %v663_v5 = vadd.f32 %v618_v58, %v591_v42 }
  0xf7   : > { %v390_v0 = vadd.f32 %v373_v57, %v1657_v13  ;;  %v391_v29 = vadd.f32 %v374_v48, %v1654_v12  ;;  %v382_v33 = vsel %vm375_vm2, %v331_v45, %v355_v53  ;;  %v383_v8 = vsel %vm375_vm2, %v333_v44, %v357_v52 }
  0xf8   : > { %v464_v62 = vsel %vm441_vm3, %v446_v60, %v424_v54  ;;  %v478_v43 = vadd.f32 %v470_v32, %v447_v61  ;;  %v656_v45 = vsel %vm441_vm3, %v638_v26, %v617_v37  ;;  %v670_v25 = vadd.f32 %v662_v1, %v639_v10 }
  0xf9   : > { %v529_v47 = vpop.permute.xlu1 %528  ;;  %v527_v55 = vpop.permute.xlu0 %526  ;;  %v1837_v40 = vadd.f32 %v390_v0, %v382_v33  ;;  %v399_v39 = vadd.f32 %v391_v29, %v383_v8  ;;  %v1846_v42 = vmul.f32 9.0, %v1654_v12  ;;  %v1849_v44 = vmul.f32 9.0, %v1657_v13 }
  0xfa   : > { %v479_v28 = vadd.f32 %v471_v38, %v464_v62  ;;  %v671_v24 = vadd.f32 %v663_v5, %v656_v45  ;;  %v1856_v37 = vmul.f32 9.0, %v1668_v14  ;;  %v1862_v49 = vmul.f32 9.0, %v1671_v15 }
  0xfb   : > { %v407_v51 = vrot.slane %v1837_v40, 1  ;;  %v426_v52 = vrot.slane %v1837_v40, 7  ;;  %v427_v12 = vrot.slane %v399_v39, 7  ;;  %v1864_v48 = vsub.f32 %v478_v43, %v486_v30 }
  0xfc   : > { %v1866_v57 = vsub.f32 %v670_v25, %v678_v4  ;;  %v1869_v3 = vmul.f32 9.0, %v1682_v16  ;;  %v448_v60 = vrot.slane %v399_v39, 1  ;;  %v1882_v29 = vmul.f32 9.0, %v1692_v18 }
  0xfd   : > { %v553_v34 = vpop.permute.xlu1 %552  ;;  %v551_v35 = vpop.permute.xlu0 %550  ;;  %v1885_v30 = vmul.f32 9.0, %v1695_v19  ;;  %v1890_v32 = vmul.f32 9.0, %v1710_v20  ;;  %v1893_v1 = vmul.f32 9.0, %v1713_v21  ;;  %v886_v4 = vand.u32 2147483647, %v1864_v48 }
  0xfe   : > { %v569_v9 = vsel %vm366_vm1, %v529_v47, %v553_v34  ;;  %v568_v11 = vsel %vm366_vm1, %v527_v55, %v551_v35  ;;  %v577_v53 = vsel %vm375_vm2, %v529_v47, %v553_v34  ;;  %v576_v13 = vsel %vm375_vm2, %v527_v55, %v551_v35 }
  0xff   : > { %v585_v36 = vadd.f32 %v569_v9, %v1668_v14  ;;  %v584_v54 = vadd.f32 %v568_v11, %v1671_v15  ;;  %v1871_v47 = vsub.f32 %v479_v28, %v487_v63  ;;  %v1873_v14 = vsub.f32 %v671_v24, %v679_v31 }
 0x100   : > { %v1878_v55 = vmul.f32 9.0, %v1685_v17  ;;  %v440_v15 = vsel %vm416_vm4, %v407_v51, %v426_v52  ;;  %v428_v63 = vsel %vm416_vm4, %v426_v52, %v427_v12  ;;  %v894_v38 = vand.u32 2147483647, %v1866_v57 }
 0x101   : > { %v709_v41 = vpop.permute.xlu1 %708  ;;  %v707_v6 = vpop.permute.xlu0 %706  ;;  %v1858_v27 = vadd.f32 %v585_v36, %v577_v53  ;;  %v592_v59 = vadd.f32 %v584_v54, %v576_v13  ;;  %v887_v5 = vand.u32 2147483647, %v1871_v47  ;;  %v895_v33 = vand.u32 2147483647, %v1873_v14 }
 0x102   : > { %v465_v34 = vsel %vm441_vm3, %v448_v60, %v427_v12  ;;  %v472_v35 = vadd.f32 %v440_v15, %v1837_v40  ;;  %v473_v9 = vadd.f32 %v428_v63, %v399_v39  ;;  %v1908_v28 = vsub.f32 %v886_v4, %v894_v38 }
 0x103   : > { %v601_v0 = vrot.slane %v592_v59, 1  ;;  %v619_v26 = vrot.slane %v592_v59, 7  ;;  %v620_v31 = vrot.slane %v1858_v27, 7  ;;  %v640_v62 = vrot.slane %v1858_v27, 1 }
 0x104   : > { %v449_v40 = vsel %vm441_vm3, %v407_v51, %v448_v60  ;;  %v1913_v63 = vsub.f32 %v887_v5, %v895_v33  ;;  %v481_v51 = vadd.f32 %v473_v9, %v465_v34  ;;  %vm910_vm9 = vcmp.ge.f32.partialorder %v1908_v28, 0.0 }
 0x105   : > { %v713_v46 = vpop.permute.xlu1 %712  ;;  %v1875_v58 = vpop.permute.xlu0 %710  ;;  %v633_v10 = vsel %vm416_vm4, %v601_v0, %v619_v26  ;;  %v621_v43 = vsel %vm416_vm4, %v619_v26, %v620_v31  ;;  %v480_v52 = vadd.f32 %v472_v35, %v449_v40  ;;  %v872_v28 = vmul.f32 9.0, %v1727_v23 }
 0x106   : > { %v664_v53 = vadd.f32 %v633_v10, %v592_v59  ;;  %vm911_vm10 = vcmp.ge.f32.partialorder %v1913_v63, 0.0 }
 0x107   : > { %v1923_v5 = vsub.f32 %v480_v52, %v1849_v44 }
 0x109   : > { %v733_v61 = vpop.permute.xlu1 %732  ;;  %v731_v8 = vpop.permute.xlu0 %730 }
 0x10a   : > { %v755_v36 = vsel %vm366_vm1, %v709_v41, %v733_v61  ;;  %v754_v11 = vsel %vm366_vm1, %v707_v6, %v731_v8  ;;  %v763_v39 = vsel %vm375_vm2, %v709_v41, %v733_v61  ;;  %v762_v24 = vsel %vm375_vm2, %v707_v6, %v731_v8 }
 0x10b   : > { %v771_v45 = vadd.f32 %v755_v36, %v1682_v16  ;;  %v770_v25 = vadd.f32 %v754_v11, %v1685_v17  ;;  %v665_v16 = vadd.f32 %v621_v43, %v1858_v27  ;;  %v641_v41 = vsel %vm441_vm3, %v601_v0, %v640_v62 }
 0x10c   : > { %v657_v27 = vsel %vm441_vm3, %v640_v62, %v620_v31  ;;  %v672_v33 = vadd.f32 %v664_v53, %v641_v41 }
 0x10d   : > { %v779_v54 = vadd.f32 %v771_v45, %v763_v39  ;;  %v778_v12 = vadd.f32 %v770_v25, %v762_v24  ;;  %v737_v13 = vpop.permute.xlu1 %736  ;;  %v735_v15 = vpop.permute.xlu0 %734  ;;  %v673_v9 = vadd.f32 %v665_v16, %v657_v27  ;;  %v1934_v45 = vsub.f32 %v481_v51, %v1846_v42 }
 0x10e   : > { %v757_v17 = vsel %vm366_vm1, %v713_v46, %v737_v13  ;;  %v756_v26 = vsel %vm366_vm1, %v1875_v58, %v735_v15  ;;  %v765_v61 = vsel %vm375_vm2, %v713_v46, %v737_v13  ;;  %v764_v44 = vsel %vm375_vm2, %v1875_v58, %v735_v15 }
 0x10f   : > { %v803_v60 = vrot.slane %v779_v54, 7  ;;  %v826_v6 = vrot.slane %v779_v54, 1  ;;  %v790_v4 = vrot.slane %v778_v12, 1  ;;  %v802_v59 = vrot.slane %v778_v12, 7 }
 0x110   : > { %v773_v38 = vadd.f32 %v757_v17, %v1692_v18  ;;  %v772_v35 = vadd.f32 %v756_v26, %v1695_v19  ;;  %v1937_v25 = vsub.f32 %v672_v33, %v1862_v49  ;;  %v1940_v53 = vsub.f32 %v673_v9, %v1856_v37 }
 0x111   : > { %v717_v8 = vpop.permute.xlu1 %716  ;;  %v715_v34 = vpop.permute.xlu0 %714  ;;  %v804_v0 = vsel %vm416_vm4, %v802_v59, %v803_v60  ;;  %v822_v10 = vsel %vm416_vm4, %v790_v4, %v802_v59  ;;  %v846_v18 = vsel %vm441_vm3, %v826_v6, %v803_v60  ;;  %v827_v31 = vsel %vm441_vm3, %v790_v4, %v826_v6 }
 0x112   : > { %v781_v36 = vadd.f32 %v773_v38, %v765_v61  ;;  %v850_v11 = vadd.f32 %v822_v10, %v778_v12  ;;  %v851_v19 = vadd.f32 %v804_v0, %v779_v54  ;;  %v780_v46 = vadd.f32 %v772_v35, %v764_v44 }
 0x113   : > { %v896_v61 = vand.u32 2147483647, %v1937_v25  ;;  %v897_v0 = vand.u32 2147483647, %v1940_v53 }
 0x114   : > { %v806_v62 = vrot.slane %v781_v36, 7  ;;  %v828_v43 = vrot.slane %v781_v36, 1  ;;  %v858_v40 = vadd.f32 %v850_v11, %v827_v31  ;;  %v859_v39 = vadd.f32 %v851_v19, %v846_v18 }
 0x115   : > { %v741_v24 = vpop.permute.xlu1 %740  ;;  %v739_v52 = vpop.permute.xlu0 %738  ;;  %v791_v54 = vrot.slane %v780_v46, 1  ;;  %v805_v58 = vrot.slane %v780_v46, 7 }
 0x116   : > { %v759_v12 = vsel %vm366_vm1, %v717_v8, %v741_v24  ;;  %v874_v13 = vsub.f32 %v858_v40, %v1878_v55  ;;  %v875_v15 = vsub.f32 %v859_v39, %v1869_v3  ;;  %v847_v42 = vsel %vm441_vm3, %v828_v43, %v806_v62 }
 0x117   : > { %v775_v49 = vadd.f32 %v759_v12, %v1710_v20  ;;  %v807_v16 = vsel %vm416_vm4, %v805_v58, %v806_v62  ;;  %v823_v17 = vsel %vm416_vm4, %v791_v54, %v805_v58  ;;  %v767_v26 = vsel %vm375_vm2, %v717_v8, %v741_v24 }
 0x118   : > { %v758_v37 = vsel %vm366_vm1, %v715_v34, %v739_v52  ;;  %v922_v51 = vsub.f32 %v1816_v2, %v874_v13  ;;  %v923_v41 = vsub.f32 %v1812_v50, %v875_v15  ;;  %v852_v60 = vadd.f32 %v823_v17, %v780_v46 }
 0x119   : > { %v853_v55 = vadd.f32 %v807_v16, %v781_v36  ;;  %v721_v6 = vpop.permute.xlu1 %720  ;;  %v719_v3 = vpop.permute.xlu0 %718  ;;  %v829_v4 = vsel %vm441_vm3, %v791_v54, %v828_v43  ;;  %v783_v59 = vadd.f32 %v775_v49, %v767_v26  ;;  %v766_v20 = vsel %vm375_vm2, %v715_v34, %v739_v52 }
 0x11a   : > { %v774_v38 = vadd.f32 %v758_v37, %v1713_v21  ;;  %v930_v35 = vand.u32 2147483647, %v922_v51  ;;  %v931_v27 = vand.u32 2147483647, %v923_v41  ;;  %v860_v2 = vadd.f32 %v852_v60, %v829_v4 }
 0x11b   : > { %v861_v33 = vadd.f32 %v853_v55, %v847_v42  ;;  %v888_v50 = vand.u32 2147483647, %v1923_v5  ;;  %v809_v8 = vrot.slane %v783_v59, 7  ;;  %v830_v10 = vrot.slane %v783_v59, 1 }
 0x11c   : > { %v782_v9 = vadd.f32 %v774_v38, %v766_v20  ;;  %v876_v34 = vsub.f32 %v860_v2, %v1885_v30  ;;  %v939_v11 = vsel %vm300_vm0, %v930_v35, 0.0  ;;  %v946_v62 = vsel %vm300_vm0, %v931_v27, 0.0 }
 0x11d   : > { %v877_v21 = vsub.f32 %v861_v33, %v1882_v29  ;;  %v745_v36 = vpop.permute.xlu1 %744  ;;  %v743_v18 = vpop.permute.xlu0 %742  ;;  %v848_v13 = vsel %vm441_vm3, %v830_v10, %v809_v8  ;;  %v889_v26 = vand.u32 2147483647, %v1934_v45  ;;  %v918_v20 = vsel %vm910_vm9, %v1864_v48, %v1866_v57 }
 0x11e   : > { %v792_v19 = vrot.slane %v782_v9, 1  ;;  %v808_v44 = vrot.slane %v782_v9, 7  ;;  %v761_v31 = vsel %vm366_vm1, %v721_v6, %v745_v36  ;;  %v924_v43 = vsub.f32 %v1818_v7, %v876_v34 }
 0x11f   : > { %v925_v46 = vsub.f32 %v1820_v56, %v877_v21  ;;  %v777_v40 = vadd.f32 %v761_v31, %v1724_v22  ;;  %v769_v39 = vsel %vm375_vm2, %v721_v6, %v745_v36  ;;  %v760_v24 = vsel %vm366_vm1, %v719_v3, %v743_v18 }
 0x120   : > { %v810_v30 = vsel %vm416_vm4, %v808_v44, %v809_v8  ;;  %v824_v29 = vsel %vm416_vm4, %v792_v19, %v808_v44  ;;  %v932_v52 = vand.u32 2147483647, %v924_v43  ;;  %v831_v7 = vsel %vm441_vm3, %v792_v19, %v830_v10 }
 0x121   : > { %v933_v54 = vand.u32 2147483647, %v925_v46  ;;  %v854_v58 = vadd.f32 %v824_v29, %v782_v9  ;;  %v855_v12 = vadd.f32 %v810_v30, %v783_v59  ;;  %v785_v15 = vadd.f32 %v777_v40, %v769_v39 }
 0x122   : > { %v776_v56 = vadd.f32 %v760_v24, %v1727_v23  ;;  %v940_v42 = vsel %vm300_vm0, %v932_v52, 0.0  ;;  %v768_v41 = vsel %vm375_vm2, %v719_v3, %v743_v18  ;;  %v904_v59 = vsub.f32 %v888_v50, %v896_v61 }
 0x123   : > { %v947_v49 = vsel %vm300_vm0, %v933_v54, 0.0  ;;  %v862_v16 = vadd.f32 %v854_v58, %v831_v7  ;;  %v863_v17 = vadd.f32 %v855_v12, %v848_v13  ;;  %v941_v37 = vadd.f32 %v940_v42, %v939_v11 }
 0x124   : > { %v948_v51 = vadd.f32 %v947_v49, %v946_v62  ;;  %v812_v6 = vrot.slane %v785_v15, 7  ;;  %v784_v4 = vadd.f32 %v776_v56, %v768_v41  ;;  %v919_v38 = vsel %vm911_vm10, %v1871_v47, %v1873_v14 }
 0x125   : > { %v878_v60 = vsub.f32 %v862_v16, %v1893_v1  ;;  %v879_v55 = vsub.f32 %v863_v17, %v1890_v32  ;;  %v905_v35 = vsub.f32 %v889_v26, %v897_v0  ;;  %v832_v27 = vrot.slane %v785_v15, 1 }
 0x126   : > { %v793_v3 = vrot.slane %v784_v4, 1  ;;  %v811_v2 = vrot.slane %v784_v4, 7  ;;  %v873_v61 = vmul.f32 9.0, %v1724_v22  ;;  %vm912_vm11 = vcmp.ge.f32.partialorder %v904_v59, 0.0 }
 0x127   : > { %v926_v1 = vsub.f32 %v918_v20, %v878_v60  ;;  %v927_v33 = vsub.f32 %v919_v38, %v879_v55  ;;  %vm913_vm12 = vcmp.ge.f32.partialorder %v905_v35, 0.0  ;;  %v849_v47 = vsel %vm441_vm3, %v832_v27, %v812_v6 }
 0x128   : > { %v813_v32 = vsel %vm416_vm4, %v811_v2, %v812_v6  ;;  %v825_v50 = vsel %vm416_vm4, %v793_v3, %v811_v2  ;;  %v833_v14 = vsel %vm441_vm3, %v793_v3, %v832_v27  ;;  %v920_v22 = vsel %vm912_vm11, %v1923_v5, %v1937_v25 }
 0x129   : > { %v856_v48 = vadd.f32 %v825_v50, %v784_v4  ;;  %v857_v57 = vadd.f32 %v813_v32, %v785_v15  ;;  %v934_v63 = vand.u32 2147483647, %v926_v1  ;;  %v935_v8 = vand.u32 2147483647, %v927_v33 }
 0x12a   : > { %v921_v23 = vsel %vm913_vm12, %v1934_v45, %v1940_v53  ;;  %v954_v45 = vld [vmem:[%s1738_s9] sm:$0xff] }
 0x12b   : > { %v864_v9 = vadd.f32 %v856_v48, %v833_v14  ;;  %v865_v0 = vadd.f32 %v857_v57, %v849_v47  ;;  %v942_v10 = vsel %vm300_vm0, %v934_v63, 0.0  ;;  %v949_v36 = vsel %vm300_vm0, %v935_v8, 0.0 }
 0x12c   : > { %v943_v31 = vadd.f32 %v942_v10, %v941_v37  ;;  %v950_v62 = vadd.f32 %v949_v36, %v948_v51 }
 0x12d   : > { %v880_v34 = vsub.f32 %v864_v9, %v872_v28  ;;  %v881_v21 = vsub.f32 %v865_v0, %v873_v61 }
 0x12f   : > { %v928_v18 = vsub.f32 %v920_v22, %v880_v34  ;;  %v929_v11 = vsub.f32 %v921_v23, %v881_v21 }
 0x131   : > { %v936_v19 = vand.u32 2147483647, %v928_v18  ;;  %v937_v44 = vand.u32 2147483647, %v929_v11 }
 0x133   : > { %v944_v43 = vsel %vm300_vm0, %v936_v19, 0.0  ;;  %v951_v5 = vsel %vm300_vm0, %v937_v44, 0.0 }
 0x134   : > { %v945_v25 = vadd.f32 %v944_v43, %v943_v31  ;;  %v952_v46 = vadd.f32 %v951_v5, %v950_v62 }
 0x136   : > { %v953_v53 = vadd.f32 %v952_v46, %v945_v25 }
 0x138   : > { %v955_v40 = vadd.f32 %v954_v45, %v953_v53 }
 0x13a   : > { %956 = vst.msk [vmem:[%s1738_s9] sm:$0xff] %vm300_vm0, %v955_v40 }
 0x13b   : > { %1300 = shalt.err (!%p1297_p12)
}
 0x13c   : > { %s1301_s4 = scalar_lea.hbm %s969_s6, 128  ;;  %s1305_s10 = scalar_lea.hbm %s2051_s3, 256 }
 0x13d   : > { %p1302_p1 = scmp.ne.s32.totalorder %s969_s6, %s1301_s4  ;;  %p1306_p6 = scmp.lt.s32.totalorder %s969_s6, %s2051_s3 }
 0x13e   : > { %p1307_p7 = scmp.lt.s32.totalorder %s1305_s10, %s1301_s4 }
 0x13f   : > { %p1303_p2 = pnand %p1302_p1, %p1457_p9 }
 0x140   : > { %p1308_p8 = por %p1307_p7, %p1306_p6 }
 0x141   : > { %p1304_p5 = pneg %p1303_p2 }
 0x143   : > { %p1309_p0 = pnand %p1308_p8, %p1304_p5 }
 0x145   : > { %1312 = shalt.err (!%p1309_p0)
}
 0x146   : > { %1132 = dma.vmem_to_hbm [thread:$0]  (%p1457_p9), %s972_s16, 128, %s969_s6, %s958_s22  }
 0x147 PF: > { %s983_s11 = sand.u32 1, %s1351_s12   ;;  %p2070_p3 = scmp.ge.s32.totalorder %s1371_s17, 2 }
 0x148   : > { %s984_s5 = scalar_lea.sflag [#allocation4], %s983_s11 }
 0x149   : > { %p1145_p4 = pnand %p2070_p3, %p1464_p11 }
 0x14b   : > { %p1146_p10 = pneg %p1145_p4 }
 0x14d   : > { %1346 = dma.done.wait (%p1146_p10), %s984_s5, 128  }
 0x14e   : > { %1348 = vsyncadd (%p1146_p10), %s984_s5, 4294967168  ;;  %s22_s17 = sadd.s32 1, %s1371_s17   ;;  %s2071_s18 = sld [smem:[#allocation14_spill]] }
 0x14f   : > { %p19_p13 = scmp.ge.s32.totalorder %s22_s17, 4   ;;  %s2072_s15 = sld [smem:[#allocation12_spill]] }
 0x150   : > { %s2073_s16 = sld [smem:[#allocation13_spill]]  ;;  %s2074_s12 = smov %s1355_s13 }
 0x151   : > { %s2075_s13 = smov %s1359_s14  ;;  %21 = sbr.rel (!%p19_p13) target bundleno = 10 (0xa), region = 105 }
 0x154   : > { %s2076_s14 = smov %s2071_s18 }
 0x156   :  { %989 = vsyncpa [#allocation3], 1 }
 0x157   :  { %991 = vsyncpa [#allocation3 + $0x1], 1 }
 0x158   :  { %992 = vsyncpa [#allocation6], 1 }
 0x159   :  { %994 = vsyncpa [#allocation6 + $0x1], 1 }
 0x15a   :  { %995 = vsyncpa [#allocation4], 1 }
 0x15b   :  { %997 = vsyncpa [#allocation4 + $0x1], 1 }

</bundles_post_ra>
